<compile_context>
chip_gen: v7x
topology: tpu7x:2x2x1
jax: 0.10.0
libtpu: 0.0.40
codegen_flags: <defaults>
</compile_context>

<pallas_src>
import functools

import jax
import jax.numpy as jnp
from jax.experimental import pallas as pl
from jax.experimental.pallas import tpu as pltpu

LANE = 128
SUBLANE = 8
MAX_BLOCK_ROWS = 8192  # 8192 x 128 x f32 = 4 MiB per input block.
                       # reduce path: 2 in x 2 bufs x 4 MiB            = 16 MiB
                       # 'none' path: + 2 x 4 MiB output bufs          = 24 MiB
                       # -> fits a 40 MiB scoped limit with headroom even on
                       #    v7x's 64 MiB physical VMEM.


def _round_up(x, m):
    return (x + m - 1) // m * m


def _cdiv(a, b):
    return -(-a // b)


def _pow_gamma(z, gamma):
    """z**gamma for z>=0, avoiding generic pow for the common gammas."""
    if gamma == 0.0:
        return jnp.ones_like(z)
    if gamma == 1.0:
        return z
    if gamma == 1.5:
        return z * jnp.sqrt(z)
    if gamma == 2.0:
        return z * z
    return z ** gamma


def _focal_terms(x, t, gamma, alpha):
    """Per-element focal loss; x, t are f32 tiles inside the kernel."""
    e = jnp.exp(-jnp.abs(x))                             # EUP, shared exp
    bce = jnp.maximum(x, 0.0) - x * t + jnp.log(1.0 + e)  # stable BCE-with-logits
    r = pl.reciprocal(1.0 + e, approx=True)               # EUP approx recip (~1e-4 rel)
    p = jnp.where(x >= 0.0, r, e * r)                     # sigmoid(x)
    # (1 - p_t) == p + t*(1 - 2p); clamp guards sqrt() against tiny negative
    # values caused by the approximate reciprocal.
    one_minus_pt = jnp.maximum(p + t * (1.0 - 2.0 * p), 0.0)
    # alpha_factor == (1-alpha) + t*(2*alpha - 1): constants fold at trace time.
    alpha_factor = (1.0 - alpha) + t * (2.0 * alpha - 1.0)
    return bce * (alpha_factor * _pow_gamma(one_minus_pt, gamma))


def _partial_sum(loss):
    """(block_rows, 128) -> (8, 128) partial sum with ILP-friendly chains."""
    rows = loss.shape[0]
    if rows >= 128 and rows % 64 == 0:
        # Stage 1: 8 independent accumulation chains (one per 8-row group).
        s = jnp.sum(loss.reshape(-1, 64, LANE), axis=0)            # (64, 128)
        return jnp.sum(s.reshape(SUBLANE, SUBLANE, LANE), axis=0)  # (8, 128)
    return jnp.sum(loss.reshape(-1, SUBLANE, LANE), axis=0)


def _focal_reduce_kernel(pred_ref, true_ref, out_ref, *, gamma, alpha,
                         block_rows, n_valid, need_mask, tiles):
    # Fully 'parallel' 1-D grid; each step writes its own (8,128) partial.
    x = pred_ref[...].astype(jnp.float32)
    t = true_ref[...].astype(jnp.float32)
    loss = _focal_terms(x, t, gamma, alpha)               # (block_rows, 128)

    if not need_mask:
        out_ref[...] = _partial_sum(loss)
    else:
        i = pl.program_id(0)

        @pl.when(i < tiles - 1)
        def _():
            out_ref[...] = _partial_sum(loss)

        @pl.when(i == tiles - 1)
        def _():
            # Zero the ragged tail (partial-block garbage rows + lane pad)
            # before reducing. Only the last tile pays these VPU ops.
            row = jax.lax.broadcasted_iota(jnp.int32, loss.shape, 0)
            col = jax.lax.broadcasted_iota(jnp.int32, loss.shape, 1)
            idx = (i * block_rows + row) * LANE + col
            out_ref[...] = _partial_sum(jnp.where(idx < n_valid, loss, 0.0))


def _focal_none_kernel(pred_ref, true_ref, out_ref, *, gamma, alpha):
    x = pred_ref[...].astype(jnp.float32)
    t = true_ref[...].astype(jnp.float32)
    out_ref[...] = _focal_terms(x, t, gamma, alpha).astype(out_ref.dtype)


def focal_loss(pred, true, *, gamma=1.5, alpha=0.25, reduction="mean"):
    """FocalLoss(nn.BCEWithLogitsLoss()) forward. reduction in {'mean','sum','none'}."""
    assert pred.shape == true.shape
    if reduction not in ("mean", "sum", "none"):
        raise ValueError(f"unknown reduction {reduction!r}")
    orig_shape = pred.shape
    n_valid = int(pred.size)

    # ---- lane-dense slab (zero-copy whenever numel % 128 == 0) ---------------
    rows_valid = _cdiv(n_valid, LANE)
    pred_f = pred.reshape(-1)
    true_f = true.reshape(-1)
    lane_pad = rows_valid * LANE - n_valid
    if lane_pad:
        # Ragged lane tail: one unavoidable copy to form a (rows, 128) slab.
        # Loss-neutral pad values; the in-kernel mask zeroes them exactly anyway.
        pred_f = jnp.pad(pred_f, (0, lane_pad), constant_values=-100.0)
        true_f = jnp.pad(true_f, (0, lane_pad), constant_values=0.0)
    pred2d = pred_f.reshape(rows_valid, LANE)
    true2d = true_f.reshape(rows_valid, LANE)

    # ---- adaptive tiling: grid exactly covers the data (<= 7 rows overshoot) --
    tiles = max(1, _cdiv(rows_valid, MAX_BLOCK_ROWS))
    block_rows = _round_up(_cdiv(rows_valid, tiles), SUBLANE)
    tiles = _cdiv(rows_valid, block_rows)
    need_mask = tiles * block_rows * LANE != n_valid  # any row / lane tail?

    in_bytes = n_valid * (pred2d.dtype.itemsize + true2d.dtype.itemsize)
    cparams = dict(vmem_limit_bytes=40 * 1024 * 1024)

    if reduction in ("mean", "sum"):
        kernel = functools.partial(
            _focal_reduce_kernel, gamma=gamma, alpha=alpha,
            block_rows=block_rows, n_valid=n_valid,
            need_mask=need_mask, tiles=tiles)
        partials = pl.pallas_call(
            kernel,
            out_shape=jax.ShapeDtypeStruct((tiles * SUBLANE, LANE), jnp.float32),
            grid_spec=pltpu.PrefetchScalarGridSpec(
                num_scalar_prefetch=0,
                grid=(tiles,),
                in_specs=[
                    pl.BlockSpec((block_rows, LANE), lambda i: (i, 0)),
                    pl.BlockSpec((block_rows, LANE), lambda i: (i, 0)),
                ],
                out_specs=pl.BlockSpec((SUBLANE, LANE), lambda i: (i, 0)),
            ),
            compiler_params=pltpu.CompilerParams(
                dimension_semantics=("parallel",), **cparams),
            cost_estimate=pl.CostEstimate(
                flops=16 * n_valid,
                transcendentals=3 * n_valid,
                bytes_accessed=in_bytes + tiles * SUBLANE * LANE * 4),
        )(pred2d, true2d)
        total = jnp.sum(partials)  # tiny (tiles*8, 128) fold outside the kernel
        if reduction == "mean":
            total = total * jnp.float32(1.0 / n_valid)
        return total

    # reduction == "none"
    kernel = functools.partial(_focal_none_kernel, gamma=gamma, alpha=alpha)
    out = pl.pallas_call(
        kernel,
        out_shape=jax.ShapeDtypeStruct((rows_valid, LANE), pred.dtype),
        grid_spec=pltpu.PrefetchScalarGridSpec(
            num_scalar_prefetch=0,
            grid=(tiles,),
            in_specs=[
                pl.BlockSpec((block_rows, LANE), lambda i: (i, 0)),
                pl.BlockSpec((block_rows, LANE), lambda i: (i, 0)),
            ],
            out_specs=pl.BlockSpec((block_rows, LANE), lambda i: (i, 0)),
        ),
        compiler_params=pltpu.CompilerParams(
            dimension_semantics=("parallel",), **cparams),
        cost_estimate=pl.CostEstimate(
            flops=16 * n_valid,
            transcendentals=3 * n_valid,
            bytes_accessed=in_bytes + n_valid * pred.dtype.itemsize),
    )(pred2d, true2d)
    out_flat = out.reshape(-1)
    if lane_pad:
        out_flat = out_flat[:n_valid]   # only costs a copy in the ragged case
    return out_flat.reshape(orig_shape)


def _focal_loss_ref(pred, true, gamma=1.5, alpha=0.25, reduction="mean"):
    x = pred.astype(jnp.float32)
    t = true.astype(jnp.float32)
    bce = jnp.maximum(x, 0.0) - x * t + jnp.log1p(jnp.exp(-jnp.abs(x)))
    p = jax.nn.sigmoid(x)
    p_t = t * p + (1 - t) * (1 - p)
    af = t * alpha + (1 - t) * (1 - alpha)
    mf = (1.0 - p_t) ** gamma
    loss = bce * af * mf
    if reduction == "mean":
        return loss.mean()
    if reduction == "sum":
        return loss.sum()
    return loss


if __name__ == "__main__":
    key = jax.random.PRNGKey(0)
    k1, k2, k3, k4, k5, k6 = jax.random.split(key, 6)

    # Small detection-style NCHW input: single tile, exact lane cover (zero-copy).
    shape = (2, 4, 16, 16)
    pred = jax.random.normal(k1, shape, dtype=jnp.float32) * 2.0
    true = (jax.random.uniform(k2, shape) > 0.7).astype(jnp.float32)

    out_mean = jax.block_until_ready(focal_loss(pred, true, reduction="mean"))
    ref_mean = _focal_loss_ref(pred, true, 1.5, 0.25, "mean")
    assert jnp.allclose(out_mean, ref_mean, rtol=5e-3, atol=5e-3), (out_mean, ref_mean)

    out_none = jax.block_until_ready(focal_loss(pred, true, reduction="none"))
    ref_none = _focal_loss_ref(pred, true, 1.5, 0.25, "none")
    assert jnp.allclose(out_none, ref_none, rtol=5e-3, atol=5e-3)

    # Ragged input: exercises the lane-tail pad + in-kernel last-tile mask.
    shape_r = (3, 5, 9, 7)  # 945 elems -> rows_valid=8, lane_pad=79, mask path
    pred_r = jax.random.normal(k3, shape_r, dtype=jnp.float32) * 2.0
    true_r = (jax.random.uniform(k4, shape_r) > 0.7).astype(jnp.float32)

    out_sum_r = jax.block_until_ready(focal_loss(pred_r, true_r, reduction="sum"))
    ref_sum_r = _focal_loss_ref(pred_r, true_r, 1.5, 0.25, "sum")
    assert jnp.allclose(out_sum_r, ref_sum_r, rtol=5e-3, atol=5e-3), (out_sum_r, ref_sum_r)

    out_none_r = jax.block_until_ready(focal_loss(pred_r, true_r, reduction="none"))
    ref_none_r = _focal_loss_ref(pred_r, true_r, 1.5, 0.25, "none")
    assert jnp.allclose(out_none_r, ref_none_r, rtol=5e-3, atol=5e-3)

    # Medium input: multi-tile adaptive blocks with an exact grid cover
    # (9216 rows -> 2 tiles x 4608, no pad, no mask) and per-tile partials.
    shape2 = (2, 4, 384, 384)
    pred2 = jax.random.normal(k5, shape2, dtype=jnp.float32) * 2.0
    true2 = (jax.random.uniform(k6, shape2) > 0.7).astype(jnp.float32)

    out_mean2 = jax.block_until_ready(focal_loss(pred2, true2, reduction="mean"))
    ref_mean2 = _focal_loss_ref(pred2, true2, 1.5, 0.25, "mean")
    assert jnp.allclose(out_mean2, ref_mean2, rtol=5e-3, atol=5e-3), (out_mean2, ref_mean2)

    out_sum2 = jax.block_until_ready(focal_loss(pred2, true2, reduction="sum"))
    ref_sum2 = _focal_loss_ref(pred2, true2, 1.5, 0.25, "sum")
    assert jnp.allclose(out_sum2, ref_sum2, rtol=5e-3, atol=5e-3), (out_sum2, ref_sum2)

    print("KERNEL_OK")
</pallas_src>

<mosaic_0001>
module attributes {stable_mosaic.version = 11 : i64} {
  func.func @_focal_reduce_kernel(%arg0: i32, %arg1: memref<16x128xf32, #tpu.memory_space<vmem>>, %arg2: memref<16x128xf32, #tpu.memory_space<vmem>>, %arg3: memref<8x128xf32, #tpu.memory_space<vmem>>) attributes {dimension_semantics = [#tpu.dimension_semantics<parallel>], iteration_bounds = array<i64: 1>, scalar_prefetch = 0 : i64, scratch_operands = 0 : i64, tpu.core_type = #tpu.core_type<tc>, window_params = [{transform_indices = @transform_0, window_bounds = array<i64: 16, 128>}, {transform_indices = @transform_1, window_bounds = array<i64: 16, 128>}, {transform_indices = @transform_2, window_bounds = array<i64: 8, 128>}]} {
    %c0 = arith.constant 0 : index
    %c0_0 = arith.constant 0 : index
    %0 = vector.load %arg1[%c0, %c0_0] : memref<16x128xf32, #tpu.memory_space<vmem>>, vector<16x128xf32>
    %c0_1 = arith.constant 0 : index
    %c0_2 = arith.constant 0 : index
    %1 = vector.load %arg2[%c0_1, %c0_2] : memref<16x128xf32, #tpu.memory_space<vmem>>, vector<16x128xf32>
    %2 = math.absf %0 : vector<16x128xf32>
    %cst = arith.constant 0.000000e+00 : f32
    %3 = vector.broadcast %cst : f32 to vector<16x128xf32>
    %4 = arith.subf %3, %2 : vector<16x128xf32>
    %5 = math.exp %4 : vector<16x128xf32>
    %cst_3 = arith.constant 0.000000e+00 : f32
    %6 = vector.broadcast %cst_3 : f32 to vector<16x128xf32>
    %7 = arith.maximumf %0, %6 : vector<16x128xf32>
    %8 = arith.mulf %0, %1 : vector<16x128xf32>
    %9 = arith.subf %7, %8 : vector<16x128xf32>
    %cst_4 = arith.constant 1.000000e+00 : f32
    %10 = vector.broadcast %cst_4 : f32 to vector<16x128xf32>
    %11 = arith.addf %10, %5 : vector<16x128xf32>
    %12 = math.log %11 : vector<16x128xf32>
    %13 = arith.addf %9, %12 : vector<16x128xf32>
    %cst_5 = arith.constant 1.000000e+00 : f32
    %14 = vector.broadcast %cst_5 : f32 to vector<16x128xf32>
    %15 = arith.addf %14, %5 : vector<16x128xf32>
    %16 = tpu.reciprocal %15 {approx = true} : vector<16x128xf32> -> vector<16x128xf32>
    %cst_6 = arith.constant 0.000000e+00 : f32
    %17 = vector.broadcast %cst_6 : f32 to vector<16x128xf32>
    %18 = arith.cmpf oge, %0, %17 : vector<16x128xf32>
    %19 = arith.mulf %5, %16 : vector<16x128xf32>
    %20 = arith.select %18, %16, %19 : vector<16x128xi1>, vector<16x128xf32>
    %cst_7 = arith.constant 2.000000e+00 : f32
    %21 = vector.broadcast %cst_7 : f32 to vector<16x128xf32>
    %22 = arith.mulf %21, %20 : vector<16x128xf32>
    %cst_8 = arith.constant 1.000000e+00 : f32
    %23 = vector.broadcast %cst_8 : f32 to vector<16x128xf32>
    %24 = arith.subf %23, %22 : vector<16x128xf32>
    %25 = arith.mulf %1, %24 : vector<16x128xf32>
    %26 = arith.addf %20, %25 : vector<16x128xf32>
    %cst_9 = arith.constant 0.000000e+00 : f32
    %27 = vector.broadcast %cst_9 : f32 to vector<16x128xf32>
    %28 = arith.maximumf %26, %27 : vector<16x128xf32>
    %cst_10 = arith.constant -5.000000e-01 : f32
    %29 = vector.broadcast %cst_10 : f32 to vector<16x128xf32>
    %30 = arith.mulf %1, %29 : vector<16x128xf32>
    %cst_11 = arith.constant 7.500000e-01 : f32
    %31 = vector.broadcast %cst_11 : f32 to vector<16x128xf32>
    %32 = arith.addf %31, %30 : vector<16x128xf32>
    %33 = math.sqrt %28 : vector<16x128xf32>
    %34 = arith.mulf %28, %33 : vector<16x128xf32>
    %35 = arith.mulf %32, %34 : vector<16x128xf32>
    %36 = arith.mulf %13, %35 : vector<16x128xf32>
    %37 = vector.shape_cast %36 : vector<16x128xf32> to vector<2x8x128xf32>
    %cst_12 = arith.constant dense<0.000000e+00> : vector<8x128xf32>
    %38 = vector.multi_reduction <add>, %37, %cst_12 [0] : vector<2x8x128xf32> to vector<8x128xf32>
    %c0_13 = arith.constant 0 : index
    %c0_14 = arith.constant 0 : index
    %39 = vector.load %arg3[%c0_13, %c0_14] : memref<8x128xf32, #tpu.memory_space<vmem>>, vector<8x128xf32>
    tpu.vector_store %arg3[%c0_13, %c0_14], %38 {strides = array<i32>} : memref<8x128xf32, #tpu.memory_space<vmem>>, vector<8x128xf32>,
    return
  }
  func.func @transform_0(%arg0: i32) -> (i32, i32) {
    %c0_i32 = arith.constant 0 : i32
    %c0_i32_0 = arith.constant 0 : i32
    return %arg0, %c0_i32 : i32, i32
  }
  func.func @transform_1(%arg0: i32) -> (i32, i32) {
    %c0_i32 = arith.constant 0 : i32
    %c0_i32_0 = arith.constant 0 : i32
    return %arg0, %c0_i32 : i32, i32
  }
  func.func @transform_2(%arg0: i32) -> (i32, i32) {
    %c0_i32 = arith.constant 0 : i32
    %c0_i32_0 = arith.constant 0 : i32
    return %arg0, %c0_i32 : i32, i32
  }
}

</mosaic_0001>

<bundles_post_ra>
// kernel: tpu_custom_call.1
= control target key start
LH: loop header
LB: loop body
LE: loop exit
PB: predicated region body
PF: predicated region fallthrough
CT: control target
= control target key end

     0   :  { %7 = vsyncpa [#allocation3], 0  ;;  %s275_s0 = inlined_call_operand.hbm [shape: f32[16,128], index: 0, kind: input, shape index: {}]   ;;  %s276_s1 = inlined_call_operand.hbm [shape: f32[16,128], index: 1, kind: input, shape index: {}]   ;;  %s277_s2 = inlined_call_operand.hbm [shape: f32[8,128], index: 2, kind: output, shape index: {}]  }
   0x1   :  { %8 = vsyncpa [#allocation6], 0 }
   0x2   :  { %9 = vsyncpa [#allocation4], 0  ;;  %s219_s9 = smov [#allocation2]   ;;  %s147_s13 = scalar_lea.hbm %s275_s0, 256 }
   0x3   :  { %s15_s10 = sshll.u32 %s219_s9, 4  ;;  %p148_p0 = scmp.ne.s32.totalorder %s275_s0, %s147_s13  ;;  %s16_s10 = int_to_ptr.vmem [resolvable:$true] %s15_s10 }
   0x4   :  { %p151_p1 = scmp.lt.u32.totalorder %s147_s13, %s275_s0 }
   0x6   :  { %p153_p2 = pnand %p151_p1, %p148_p0 }
   0x8   :  { %156 = shalt.err (!%p153_p2)
}
   0x9   :  { %s157_s18 = scalar_lea.vmem %s16_s10, 256  ;;  %p162_p4 = scmp.lt.s32.totalorder %s16_s10, %s16_s10 }
   0xa   :  { %p158_p3 = scmp.ne.s32.totalorder %s16_s10, %s157_s18  ;;  %p163_p5 = scmp.lt.s32.totalorder %s157_s18, %s157_s18 }
   0xc   :  { %p164_p6 = por %p163_p5, %p162_p4 }
   0xe   :  { %p165_p7 = pnand %p164_p6, %p158_p3 }
  0x10   :  { %168 = shalt.err (!%p165_p7)
}
  0x11   :  { %s220_s19 = smov 128   ;;  %s221_s20 = smov 8  }
  0x12   :  { %21 = dma.hbm_to_vmem [thread:$0]  %s275_s0, 256, %s16_s10, [#allocation3], %s220_s19, %s220_s19, %s221_s20  }
  0x13   :  { %s222_s23 = smov [#allocation5]   ;;  %s169_s27 = scalar_lea.hbm %s276_s1, 256 }
  0x14   :  { %s27_s24 = sshll.u32 %s222_s23, 4  ;;  %p170_p8 = scmp.ne.s32.totalorder %s276_s1, %s169_s27  ;;  %s28_s24 = int_to_ptr.vmem [resolvable:$true] %s27_s24 }
  0x15   :  { %p173_p9 = scmp.lt.u32.totalorder %s169_s27, %s276_s1 }
  0x17   :  { %p175_p10 = pnand %p173_p9, %p170_p8 }
  0x19   :  { %178 = shalt.err (!%p175_p10)
}
  0x1a   :  { %s179_s4 = scalar_lea.vmem %s28_s24, 256  ;;  %p184_p12 = scmp.lt.s32.totalorder %s28_s24, %s28_s24 }
  0x1b   :  { %p180_p11 = scmp.ne.s32.totalorder %s28_s24, %s179_s4  ;;  %p185_p13 = scmp.lt.s32.totalorder %s179_s4, %s179_s4 }
  0x1d   :  { %p186_p0 = por %p185_p13, %p184_p12 }
  0x1f   :  { %p187_p1 = pnand %p186_p0, %p180_p11 }
  0x21   :  { %190 = shalt.err (!%p187_p1)
}
  0x22   :  { %33 = dma.hbm_to_vmem [thread:$0]  %s276_s1, 256, %s28_s24, [#allocation6], %s220_s19, %s220_s19, %s221_s20  }
  0x23   :  { %213 = dma.done.wait [#allocation3], 256  }
  0x24   :  { %214 = vsyncadd [#allocation3], 4294967040 }
  0x25   :  { %215 = dma.done.wait [#allocation6], 256  }
  0x26   :  { %216 = vsyncadd [#allocation6], 4294967040  ;;  %v40_v0 = vld [vmem:[#allocation2] sm:$0xff]  ;;  %v41_v1 = vld [vmem:[#allocation2 + $0x8] sm:$0xff]  ;;  %s223_s1 = smov [#allocation7]  }
  0x27   :  { %v44_v2 = vand.u32 2147483647, %v40_v0  ;;  %v45_v3 = vand.u32 2147483647, %v41_v1  ;;  %vm68_vm0 = vcmp.ge.f32.partialorder %v40_v0, 0.0  ;;  %vm69_vm1 = vcmp.ge.f32.partialorder %v41_v1, 0.0 }
  0x28   :  { %v42_v19 = vld [vmem:[#allocation5] sm:$0xff]  ;;  %v43_v21 = vld [vmem:[#allocation5 + $0x8] sm:$0xff]  ;;  %v52_v30 = vmax.f32 %v40_v0, 0.0  ;;  %v53_v33 = vmax.f32 %v41_v1, 0.0  ;;  %s116_s6 = sshll.u32 %s223_s1, 4  ;;  %s117_s6 = int_to_ptr.vmem [resolvable:$true] %s116_s6 }
  0x29   :  { %v46_v4 = vsub.f32 0.0, %v44_v2  ;;  %v47_v5 = vsub.f32 0.0, %v45_v3  ;;  %v54_v31 = vmul.f32 %v42_v19, %v40_v0  ;;  %v55_v34 = vmul.f32 %v43_v21, %v41_v1  ;;  %s191_s7 = scalar_lea.vmem %s117_s6, 128  ;;  %p196_p3 = scmp.lt.s32.totalorder %s117_s6, %s117_s6 }
  0x2a   :  { %v84_v37 = vmul.f32 -0.5, %v42_v19  ;;  %v85_v40 = vmul.f32 -0.5, %v43_v21  ;;  %p192_p2 = scmp.ne.s32.totalorder %s117_s6, %s191_s7  ;;  %p197_p4 = scmp.lt.s32.totalorder %s191_s7, %s191_s7 }
  0x2b   :  { %v48_v6 = vmul.f32 1.442695, %v46_v4  ;;  %v50_v7 = vmul.f32 1.442695, %v47_v5  ;;  %v56_v36 = vsub.f32 %v52_v30, %v54_v31  ;;  %v57_v45 = vsub.f32 %v53_v33, %v55_v34 }
  0x2c   :  { %v86_v48 = vadd.f32 0.75, %v84_v37  ;;  %v87_v50 = vadd.f32 0.75, %v85_v40  ;;  %p198_p5 = por %p197_p4, %p196_p3 }
  0x2d   :  { %131 = vpow2.f32 %v48_v6 }
  0x2e   :  { %133 = vpow2.f32 %v50_v7  ;;  %p199_p6 = pnand %p198_p5, %p192_p2 }
  0x37   :  { %v132_v8 = vpop.eup %131 }
  0x38   :  { %v134_v9 = vpop.eup %133  ;;  %v58_v10 = vadd.f32 1.0, %v132_v8 }
  0x39   :  { %v59_v11 = vadd.f32 1.0, %v134_v9 }
  0x3a   :  { %135 = vrcp.f32 %v58_v10 }
  0x3b   :  { %137 = vrcp.f32 %v59_v11 }
  0x3c   :  { %139 = vlog2.f32 %v58_v10 }
  0x3d   :  { %141 = vlog2.f32 %v59_v11 }
  0x44   :  { %v136_v12 = vpop.eup %135 }
  0x45   :  { %v138_v13 = vpop.eup %137  ;;  %v70_v14 = vmul.f32 %v136_v12, %v132_v8 }
  0x46   :  { %v71_v15 = vmul.f32 %v138_v13, %v134_v9  ;;  %v140_v32 = vpop.eup %139 }
  0x47   :  { %v72_v16 = vsel %vm68_vm0, %v136_v12, %v70_v14  ;;  %v142_v35 = vpop.eup %141  ;;  %v61_v39 = vmul.f32 0.6931472, %v140_v32 }
  0x48   :  { %v73_v17 = vsel %vm69_vm1, %v138_v13, %v71_v15  ;;  %v74_v18 = vmul.f32 2.0, %v72_v16  ;;  %v63_v46 = vmul.f32 0.6931472, %v142_v35 }
  0x49   :  { %v75_v20 = vmul.f32 2.0, %v73_v17  ;;  %v64_v53 = vadd.f32 %v61_v39, %v56_v36 }
  0x4a   :  { %v76_v22 = vsub.f32 1.0, %v74_v18  ;;  %v65_v56 = vadd.f32 %v63_v46, %v57_v45 }
  0x4b   :  { %v77_v23 = vsub.f32 1.0, %v75_v20 }
  0x4c   :  { %v78_v24 = vmul.f32 %v76_v22, %v42_v19 }
  0x4d   :  { %v79_v25 = vmul.f32 %v77_v23, %v43_v21 }
  0x4e   :  { %v80_v26 = vadd.f32 %v78_v24, %v72_v16 }
  0x4f   :  { %v81_v27 = vadd.f32 %v79_v25, %v73_v17 }
  0x50   :  { %v82_v28 = vmax.f32 %v80_v26, 0.0 }
  0x51   :  { %v83_v29 = vmax.f32 %v81_v27, 0.0 }
  0x52   :  { %143 = vrsqrt.f32 %v82_v28  ;;  %vm90_vm2 = vcmp.eq.f32.partialorder %v82_v28, inf  ;;  %v93_v41 = vand.u32 2147483648, %v82_v28  ;;  %vm92_vm3 = vcmp.eq.f32.partialorder %v82_v28, 0.0 }
  0x53   :  { %145 = vrsqrt.f32 %v83_v29  ;;  %vm97_vm4 = vcmp.eq.f32.partialorder %v83_v29, inf  ;;  %v100_v44 = vand.u32 2147483648, %v83_v29  ;;  %vm99_vm5 = vcmp.eq.f32.partialorder %v83_v29, 0.0 }
  0x5c   :  { %v144_v38 = vpop.eup %143 }
  0x5d   :  { %v146_v42 = vpop.eup %145  ;;  %v89_v43 = vmul.f32 %v144_v38, %v82_v28 }
  0x5e   :  { %v96_v47 = vmul.f32 %v146_v42, %v83_v29 }
  0x5f   :  { %v91_v49 = vsel %vm90_vm2, %v82_v28, %v89_v43 }
  0x60   :  { %v94_v51 = vsel %vm92_vm3, %v93_v41, %v91_v49  ;;  %v98_v52 = vsel %vm97_vm4, %v83_v29, %v96_v47 }
  0x61   :  { %v101_v54 = vsel %vm99_vm5, %v100_v44, %v98_v52  ;;  %v102_v55 = vmul.f32 %v94_v51, %v82_v28 }
  0x62   :  { %v103_v57 = vmul.f32 %v101_v54, %v83_v29 }
  0x63   :  { %v104_v58 = vmul.f32 %v102_v55, %v86_v48 }
  0x64   :  { %v105_v59 = vmul.f32 %v103_v57, %v87_v50 }
  0x65   :  { %v106_v60 = vmul.f32 %v104_v58, %v64_v53 }
  0x66   :  { %v107_v61 = vmul.f32 %v105_v59, %v65_v56 }
  0x68   :  { %v108_v62 = vadd.f32 %v107_v61, %v106_v60 }
  0x6a   :  { %109 = vst [vmem:[#allocation7] sm:$0xff] %v108_v62 }
  0x6b   :  { %202 = shalt.err (!%p199_p6)
}
  0x6c   :  { %s203_s10 = scalar_lea.hbm %s277_s2, 128 }
  0x6d   :  { %p204_p7 = scmp.ne.s32.totalorder %s277_s2, %s203_s10  ;;  %p207_p8 = scmp.lt.u32.totalorder %s203_s10, %s277_s2 }
  0x6f   :  { %p209_p9 = pnand %p207_p8, %p204_p7 }
  0x71   :  { %212 = shalt.err (!%p209_p9)
}
  0x72   :  { %119 = dma.vmem_to_hbm [thread:$0]  %s117_s6, 128, %s277_s2, [#allocation4]  }
  0x73   :  { %217 = dma.done.wait [#allocation4], 128  }
  0x74   :  { %218 = vsyncadd [#allocation4], 4294967168 }
  0x75   :  { %123 = vsyncpa [#allocation3], 1 }
  0x76   :  { %124 = vsyncpa [#allocation6], 1 }
  0x77   :  { %125 = vsyncpa [#allocation4], 1 }

</bundles_post_ra>
